<compile_context>
chip_gen: v5e
topology: v5e:2x2
jax: 0.10.0
libtpu: 0.0.40
codegen_flags: <defaults>
</compile_context>

<pallas_src>
import functools
import math

import jax
import jax.numpy as jnp
from jax.experimental import pallas as pl
from jax.experimental.pallas import tpu as pltpu


def _round_up(x: int, m: int) -> int:
    return (x + m - 1) // m * m


# --------------------------------------------------------------- kernel -----

def _lif_kernel(v_in_ref, dv_ref, spike_ref, v_out_ref, *scratch,
                inv_tau, v_threshold, v_reset, hard_reset):
    """One fused LIF timestep on a (tile_rows, lanes) slab.

    grid = (row_tiles, T); axis 1 ("arbitrary") carries the membrane potential.
    With no scratch (f32 state) the resident output block is the accumulator;
    otherwise an f32 scratch accumulates and is flushed on the last timestep.
    """
    acc = scratch[0] if scratch else v_out_ref
    t = pl.program_id(1)

    @pl.when(t == 0)
    def _init():
        acc[...] = v_in_ref[...].astype(acc.dtype)

    v = acc[...].astype(jnp.float32)
    dv = dv_ref[0].astype(jnp.float32)

    # Charge: v += (dv - (v - v_reset)) / tau   (strength-reduced to * 1/tau)
    if hard_reset and v_reset != 0.0:
        v = v + (dv - (v - v_reset)) * inv_tau
    else:
        v = v + (dv - v) * inv_tau

    # Fire: Heaviside(v - v_threshold)
    spiked = v >= v_threshold
    spike_ref[0] = jnp.where(spiked, 1.0, 0.0).astype(spike_ref.dtype)

    # Reset.
    if hard_reset:
        v = jnp.where(spiked, v_reset, v)            # hard_voltage_transform
    else:
        v = jnp.where(spiked, v - v_threshold, v)    # soft_voltage_transform

    acc[...] = v.astype(acc.dtype)

    if scratch:
        @pl.when(t == pl.num_programs(1) - 1)
        def _flush():
            v_out_ref[...] = acc[...].astype(v_out_ref.dtype)


# ------------------------------------------------------------ tiling --------

def _choose_layout(total, itemsize, target_block_bytes):
    """Pick (lanes, rows, tile_rows, padded_rows) for a flat tensor of `total` elems.

    Prefers lane widths / row tiles that divide exactly (no pad/slice copies),
    rounds tile_rows to a multiple of 32, and keeps >= 2 row tiles when
    rows >= 16 so the 'parallel' axis shards across both v7x TensorCores.
    """
    lanes = None
    for cand in (512, 256, 128):
        if total % cand == 0:
            lanes = cand
            break
    if lanes is None:                              # padding unavoidable
        lanes = 128 if total < 4096 else 512
    rows = _round_up(total, lanes) // lanes

    if rows < 16:                                  # one full-extent tile
        return lanes, rows, rows, rows

    desired = max(8, (target_block_bytes // (lanes * itemsize)) // 32 * 32)
    max_tile = max(8, min(desired, (rows // 2) // 8 * 8))   # >= 2 tiles
    for align in (32, 8):                          # prefer 32-row alignment
        start = max_tile // align * align
        for t in range(start, 0, -align):
            if rows % t == 0:
                return lanes, rows, t, rows        # divides -> no padding
    if rows * lanes * itemsize <= 2 * target_block_bytes:
        return lanes, rows, rows, rows             # odd rows: full-extent tile beats pad copies
    t = max(8, min(desired, rows) // 8 * 8)
    return lanes, rows, t, _round_up(rows, t)      # rare fallback: pad rows


# ------------------------------------------------------------ core call -----

@functools.partial(
    jax.jit,
    static_argnames=("tile_rows", "tau", "v_threshold", "v_reset", "spike_dtype"))
def _lif_forward_2d(v2, dv2, *, tile_rows, tau, v_threshold, v_reset, spike_dtype):
    """Fused T-step LIF on pre-laid-out slabs: v2 (rows,lanes), dv2 (T,rows,lanes)."""
    T, rows, lanes = dv2.shape
    assert v2.shape == (rows, lanes), (v2.shape, dv2.shape)
    assert rows % tile_rows == 0, (rows, tile_rows)
    v_dtype = v2.dtype
    spike_dtype = jnp.dtype(spike_dtype)
    hard_reset = v_reset is not None
    reset_val = float(v_reset) if hard_reset else 0.0
    use_scratch = jnp.dtype(v_dtype) != jnp.dtype(jnp.float32)

    kernel = functools.partial(
        _lif_kernel,
        inv_tau=float(1.0 / tau),
        v_threshold=float(v_threshold),
        v_reset=reset_val,
        hard_reset=hard_reset,
    )

    block_elems = tile_rows * lanes
    vbytes = jnp.dtype(v_dtype).itemsize
    dvbytes = jnp.dtype(dv2.dtype).itemsize
    sbytes = spike_dtype.itemsize

    scratch_shapes = []
    buf_bytes = 2 * block_elems * (2 * vbytes + dvbytes + sbytes)   # double-buffered blocks
    if use_scratch:
        scratch_shapes.append(pltpu.VMEM((tile_rows, lanes), jnp.float32))
        buf_bytes += block_elems * 4
    # Size scoped VMEM to the actual buffer sum (+ headroom); this raises v5e's
    # 16 MiB default while staying well below v7x's 64 MiB physical VMEM.
    vmem_limit = max(32 << 20, min(int(buf_bytes * 1.5) + (2 << 20), 48 << 20))

    cost = pl.CostEstimate(
        flops=5 * T * rows * lanes,
        transcendentals=0,
        bytes_accessed=T * rows * lanes * (dvbytes + sbytes) + 2 * rows * lanes * vbytes,
    )

    grid = (rows // tile_rows, T)
    spike2, v_out2 = pl.pallas_call(
        kernel,
        out_shape=(
            jax.ShapeDtypeStruct((T, rows, lanes), spike_dtype),
            jax.ShapeDtypeStruct((rows, lanes), v_dtype),
        ),
        grid_spec=pltpu.PrefetchScalarGridSpec(
            num_scalar_prefetch=0,
            grid=grid,
            in_specs=[
                # v: resident across the time axis (same block index for all t)
                pl.BlockSpec((tile_rows, lanes), lambda i, t: (i, 0)),
                # dv(t): streamed per timestep
                pl.BlockSpec((1, tile_rows, lanes), lambda i, t: (t, i, 0)),
            ],
            out_specs=[
                # spike(t): streamed per timestep
                pl.BlockSpec((1, tile_rows, lanes), lambda i, t: (t, i, 0)),
                # v out: resident accumulator, written back once per row tile
                pl.BlockSpec((tile_rows, lanes), lambda i, t: (i, 0)),
            ],
            scratch_shapes=scratch_shapes,
        ),
        compiler_params=pltpu.CompilerParams(
            dimension_semantics=("parallel", "arbitrary"),
            vmem_limit_bytes=vmem_limit,
        ),
        cost_estimate=cost,
        # Membrane potential updated in place (input 0 -> output 1).
        input_output_aliases={0: 1},
    )(v2, dv2)
    return spike2, v_out2


# ------------------------------------------------------------ wrappers ------

def lif_node_forward(v, dv_seq, *, tau=100.0, v_threshold=1.0, v_reset=0.0,
                     spike_dtype=None, target_block_bytes=2 << 20):
    """Fused multi-timestep LIF forward.

    v:      current membrane potential, shape S
    dv_seq: voltage increments, shape (T,) + S
    spike_dtype: defaults to dv's dtype; pass jnp.bfloat16 (or int8) to halve
      the spike writeback bytes — spikes are exactly {0,1} so this is lossless.
    returns (spike_seq of shape (T,) + S, updated v of shape S)
    """
    assert dv_seq.shape[1:] == v.shape, (dv_seq.shape, v.shape)
    T = dv_seq.shape[0]
    shape = v.shape
    dtype = dv_seq.dtype
    spike_dtype = jnp.dtype(dtype if spike_dtype is None else spike_dtype)
    v = v.astype(dtype)
    total = int(math.prod(shape)) if shape else 1
    hard_reset = v_reset is not None
    reset_val = float(v_reset) if hard_reset else 0.0

    lanes, rows, tile_rows, padded_rows = _choose_layout(
        total, jnp.dtype(dtype).itemsize, int(target_block_bytes))
    padded_total = padded_rows * lanes
    pad = padded_total - total

    v_flat = v.reshape(-1)
    dv_flat = dv_seq.reshape(T, -1)
    if pad:  # rare fallback: layout chooser avoids this whenever sizes divide
        v_flat = jnp.pad(v_flat, (0, pad), constant_values=reset_val)
        dv_flat = jnp.pad(dv_flat, ((0, 0), (0, pad)))
    v2 = v_flat.reshape(padded_rows, lanes)
    dv2 = dv_flat.reshape(T, padded_rows, lanes)

    spike2, v_out2 = _lif_forward_2d(
        v2, dv2, tile_rows=tile_rows, tau=float(tau),
        v_threshold=float(v_threshold),
        v_reset=None if not hard_reset else float(v_reset),
        spike_dtype=spike_dtype)

    if pad:
        spike = spike2.reshape(T, padded_total)[:, :total].reshape((T,) + shape)
        v_new = v_out2.reshape(padded_total)[:total].reshape(shape)
    else:
        spike = spike2.reshape((T,) + shape)
        v_new = v_out2.reshape(shape)
    return spike, v_new


class LIFNode:
    """Stateful wrapper mirroring SpikingFlow's LIFNode (forward only).

    `__call__(dv)` runs one timestep; `multi_step(dv_seq)` fuses T timesteps in
    a single kernel launch with v resident in VMEM. The membrane potential is
    stored in the kernel's (rows, lanes) layout between calls so the
    single-step path has no per-call pad/reshape round trip.
    """
    # TODO(synk): pulse_soft (surrogate gradient) and monitor_state only affect
    # the backward pass / host-side numpy logging; they are not part of the
    # forward kernel and are not implemented here.

    def __init__(self, tau=100.0, v_threshold=1.0, v_reset=0.0,
                 spike_dtype=None, target_block_bytes=2 << 20):
        self.tau = float(tau)
        self.v_threshold = float(v_threshold)
        self.v_reset = None if v_reset is None else float(v_reset)
        self.spike_dtype = spike_dtype
        self.target_block_bytes = int(target_block_bytes)
        self._v2 = None
        self._layout = None   # (shape, dtype, lanes, rows, tile_rows, padded_rows, total)

    def reset(self):
        self._v2 = None
        self._layout = None

    @property
    def v(self):
        if self._v2 is None:
            return 0 if self.v_reset is None else self.v_reset
        shape, _, lanes, _, _, padded_rows, total = self._layout
        return self._v2.reshape(padded_rows * lanes)[:total].reshape(shape)

    def _ensure_state(self, shape, dtype):
        shape = tuple(shape)
        dtype = jnp.dtype(dtype)
        if (self._layout is not None and self._layout[0] == shape
                and self._layout[1] == dtype):
            return
        total = int(math.prod(shape)) if shape else 1
        lanes, rows, tile_rows, padded_rows = _choose_layout(
            total, dtype.itemsize, self.target_block_bytes)
        self._layout = (shape, dtype, lanes, rows, tile_rows, padded_rows, total)
        init = 0.0 if self.v_reset is None else self.v_reset
        self._v2 = jnp.full((padded_rows, lanes), init, dtype=dtype)

    def _step(self, dv_seq):
        shape, dtype, lanes, _, tile_rows, padded_rows, total = self._layout
        T = dv_seq.shape[0]
        spike_dtype = jnp.dtype(dtype if self.spike_dtype is None else self.spike_dtype)
        dv_flat = dv_seq.reshape(T, -1)
        pad = padded_rows * lanes - total
        if pad:
            dv_flat = jnp.pad(dv_flat, ((0, 0), (0, pad)))
        dv2 = dv_flat.reshape(T, padded_rows, lanes)
        spike2, self._v2 = _lif_forward_2d(
            self._v2, dv2, tile_rows=tile_rows, tau=self.tau,
            v_threshold=self.v_threshold, v_reset=self.v_reset,
            spike_dtype=spike_dtype)
        if pad:
            return spike2.reshape(T, padded_rows * lanes)[:, :total].reshape((T,) + shape)
        return spike2.reshape((T,) + shape)

    def __call__(self, dv):
        self._ensure_state(dv.shape, dv.dtype)
        return self._step(dv[None])[0]

    def multi_step(self, dv_seq):
        self._ensure_state(dv_seq.shape[1:], dv_seq.dtype)
        return self._step(dv_seq)


# ------------------------------------------------------------ reference -----

def _ref_lif(v0, dv_seq, tau, v_th, v_reset):
    """Pure-JAX reference mirroring the kernel arithmetic (f32 accumulation)."""
    inv_tau = 1.0 / tau
    hard = v_reset is not None
    v = v0.astype(jnp.float32)
    spikes = []
    for t in range(dv_seq.shape[0]):
        dv = dv_seq[t].astype(jnp.float32)
        if hard and v_reset != 0.0:
            v = v + (dv - (v - v_reset)) * inv_tau
        else:
            v = v + (dv - v) * inv_tau
        spiked = v >= v_th
        spikes.append(jnp.where(spiked, 1.0, 0.0))
        if hard:
            v = jnp.where(spiked, v_reset, v)
        else:
            v = jnp.where(spiked, v - v_th, v)
    return jnp.stack(spikes), v


if __name__ == "__main__":
    key = jax.random.PRNGKey(0)
    k1, k2, k3 = jax.random.split(key, 3)

    tau, v_th, v_rst = 2.0, 1.0, 0.0

    # ---- test 1: f32, hard reset, stateful node (fused T-step + single step)
    N, C, H, W = 2, 4, 16, 16
    T = 4
    dv_seq = jax.random.normal(k1, (T, N, C, H, W), dtype=jnp.float32) * 2.0
    extra_dv = jax.random.normal(k2, (N, C, H, W), dtype=jnp.float32) * 2.0

    node = LIFNode(tau=tau, v_threshold=v_th, v_reset=v_rst)
    spikes = node.multi_step(dv_seq)          # fused T-step kernel call
    spike_extra = node(extra_dv)              # single-step path, state carried
    jax.block_until_ready((spikes, spike_extra, node.v))

    s_ref, v_ref = _ref_lif(jnp.zeros((N, C, H, W), jnp.float32), dv_seq, tau, v_th, v_rst)
    s_ref_extra, v_ref = _ref_lif(v_ref, extra_dv[None], tau, v_th, v_rst)
    assert spikes.shape == (T, N, C, H, W) and spikes.dtype == jnp.float32
    assert jnp.array_equal(spikes, s_ref.astype(jnp.float32))
    assert jnp.array_equal(spike_extra, s_ref_extra[0].astype(jnp.float32))
    assert jnp.allclose(node.v, v_ref, atol=1e-5, rtol=1e-5)

    # ---- test 2: bf16 dv + bf16 spikes (halves streamed bytes), 2 row tiles
    shape2 = (4, 8, 32, 32)                   # 32768 elems -> (64, 512) slab
    T2 = 3
    dv_bf16 = (jax.random.normal(k3, (T2,) + shape2, jnp.float32) * 2.0).astype(jnp.bfloat16)
    v0_bf16 = jnp.zeros(shape2, jnp.bfloat16)
    spikes2, v_new2 = lif_node_forward(
        v0_bf16, dv_bf16, tau=tau, v_threshold=v_th, v_reset=v_rst,
        spike_dtype=jnp.bfloat16)
    jax.block_until_ready((spikes2, v_new2))

    s_ref2, v_ref2 = _ref_lif(v0_bf16, dv_bf16, tau, v_th, v_rst)
    assert spikes2.dtype == jnp.dtype(jnp.bfloat16)
    assert jnp.array_equal(spikes2, s_ref2.astype(jnp.bfloat16))
    assert jnp.allclose(v_new2.astype(jnp.float32),
                        v_ref2.astype(jnp.bfloat16).astype(jnp.float32),
                        atol=1e-2, rtol=1e-2)

    # ---- test 3: soft reset (v_reset=None) via the functional entry point
    spikes3, v_new3 = lif_node_forward(
        jnp.zeros((N, C, H, W), jnp.float32), dv_seq,
        tau=tau, v_threshold=v_th, v_reset=None)
    jax.block_until_ready((spikes3, v_new3))
    s_ref3, v_ref3 = _ref_lif(jnp.zeros((N, C, H, W), jnp.float32), dv_seq, tau, v_th, None)
    assert jnp.array_equal(spikes3, s_ref3.astype(jnp.float32))
    assert jnp.allclose(v_new3, v_ref3, atol=1e-5, rtol=1e-5)

    print("KERNEL_OK")
</pallas_src>

<mosaic_0001>
module attributes {stable_mosaic.version = 11 : i64} {
  func.func @_lif_kernel(%arg0: i32, %arg1: i32, %arg2: memref<4x512xf32, #tpu.memory_space<vmem>>, %arg3: memref<1x4x512xf32, #tpu.memory_space<vmem>>, %arg4: memref<1x4x512xf32, #tpu.memory_space<vmem>>, %arg5: memref<4x512xf32, #tpu.memory_space<vmem>>) attributes {dimension_semantics = [#tpu.dimension_semantics<parallel>, #tpu.dimension_semantics<arbitrary>], iteration_bounds = array<i64: 1, 4>, scalar_prefetch = 0 : i64, scratch_operands = 0 : i64, tpu.core_type = #tpu.core_type<tc>, window_params = [{transform_indices = @transform_0, window_bounds = array<i64: 4, 512>}, {transform_indices = @transform_1, window_bounds = array<i64: 1, 4, 512>}, {transform_indices = @transform_2, window_bounds = array<i64: 1, 4, 512>}, {transform_indices = @transform_3, window_bounds = array<i64: 4, 512>}]} {
    %c0_i32 = arith.constant 0 : i32
    %0 = arith.cmpi eq, %arg1, %c0_i32 : i32
    %1 = arith.extui %0 : i1 to i32
    %c0_i32_0 = arith.constant 0 : i32
    %2 = arith.cmpi ne, %1, %c0_i32_0 : i32
    scf.if %2 {
      %c0_14 = arith.constant 0 : index
      %c0_15 = arith.constant 0 : index
      %21 = vector.load %arg2[%c0_14, %c0_15] : memref<4x512xf32, #tpu.memory_space<vmem>>, vector<4x512xf32>
      %c0_16 = arith.constant 0 : index
      %c0_17 = arith.constant 0 : index
      %22 = vector.load %arg5[%c0_16, %c0_17] : memref<4x512xf32, #tpu.memory_space<vmem>>, vector<4x512xf32>
      tpu.vector_store %arg5[%c0_16, %c0_17], %21 {strides = array<i32>} : memref<4x512xf32, #tpu.memory_space<vmem>>, vector<4x512xf32>,
    } else {
    }
    %c0 = arith.constant 0 : index
    %c0_1 = arith.constant 0 : index
    %3 = vector.load %arg5[%c0, %c0_1] : memref<4x512xf32, #tpu.memory_space<vmem>>, vector<4x512xf32>
    %c0_2 = arith.constant 0 : index
    %c0_3 = arith.constant 0 : index
    %c0_4 = arith.constant 0 : index
    %4 = vector.load %arg3[%c0_2, %c0_3, %c0_4] : memref<1x4x512xf32, #tpu.memory_space<vmem>>, vector<1x4x512xf32>
    %5 = vector.shape_cast %4 : vector<1x4x512xf32> to vector<4x512xf32>
    %6 = arith.subf %5, %3 : vector<4x512xf32>
    %cst = arith.constant 5.000000e-01 : f32
    %7 = vector.broadcast %cst : f32 to vector<4x512xf32>
    %8 = arith.mulf %6, %7 : vector<4x512xf32>
    %9 = arith.addf %3, %8 : vector<4x512xf32>
    %cst_5 = arith.constant 1.000000e+00 : f32
    %10 = vector.broadcast %cst_5 : f32 to vector<4x512xf32>
    %11 = arith.cmpf oge, %9, %10 : vector<4x512xf32>
    %cst_6 = arith.constant 1.000000e+00 : f32
    %cst_7 = arith.constant 0.000000e+00 : f32
    %12 = vector.broadcast %cst_6 : f32 to vector<4x512xf32>
    %13 = vector.broadcast %cst_7 : f32 to vector<4x512xf32>
    %14 = arith.select %11, %12, %13 : vector<4x512xi1>, vector<4x512xf32>
    %c0_8 = arith.constant 0 : index
    %c0_9 = arith.constant 0 : index
    %c0_10 = arith.constant 0 : index
    %15 = vector.load %arg4[%c0_8, %c0_9, %c0_10] : memref<1x4x512xf32, #tpu.memory_space<vmem>>, vector<1x4x512xf32>
    %16 = vector.shape_cast %15 : vector<1x4x512xf32> to vector<4x512xf32>
    %17 = vector.shape_cast %14 : vector<4x512xf32> to vector<1x4x512xf32>
    tpu.vector_store %arg4[%c0_8, %c0_9, %c0_10], %17 {strides = array<i32>} : memref<1x4x512xf32, #tpu.memory_space<vmem>>, vector<1x4x512xf32>,
    %cst_11 = arith.constant 0.000000e+00 : f32
    %18 = vector.broadcast %cst_11 : f32 to vector<4x512xf32>
    %19 = arith.select %11, %18, %9 : vector<4x512xi1>, vector<4x512xf32>
    %c0_12 = arith.constant 0 : index
    %c0_13 = arith.constant 0 : index
    %20 = vector.load %arg5[%c0_12, %c0_13] : memref<4x512xf32, #tpu.memory_space<vmem>>, vector<4x512xf32>
    tpu.vector_store %arg5[%c0_12, %c0_13], %19 {strides = array<i32>} : memref<4x512xf32, #tpu.memory_space<vmem>>, vector<4x512xf32>,
    return
  }
  func.func @transform_0(%arg0: i32, %arg1: i32) -> (i32, i32) {
    %c0_i32 = arith.constant 0 : i32
    %c0_i32_0 = arith.constant 0 : i32
    return %arg0, %c0_i32 : i32, i32
  }
  func.func @transform_1(%arg0: i32, %arg1: i32) -> (i32, i32, i32) {
    %c0_i32 = arith.constant 0 : i32
    %c0_i32_0 = arith.constant 0 : i32
    return %arg1, %arg0, %c0_i32 : i32, i32, i32
  }
  func.func @transform_2(%arg0: i32, %arg1: i32) -> (i32, i32, i32) {
    %c0_i32 = arith.constant 0 : i32
    %c0_i32_0 = arith.constant 0 : i32
    return %arg1, %arg0, %c0_i32 : i32, i32, i32
  }
  func.func @transform_3(%arg0: i32, %arg1: i32) -> (i32, i32) {
    %c0_i32 = arith.constant 0 : i32
    %c0_i32_0 = arith.constant 0 : i32
    return %arg0, %c0_i32 : i32, i32
  }
}

</mosaic_0001>

<bundles_post_ra>
// kernel: _lif_forward_2d.1
= control target key start
LH: loop header
LB: loop body
LE: loop exit
PB: predicated region body
PF: predicated region fallthrough
CT: control target
= control target key end

     0   :  { %9 = vsyncpa [#allocation3], 0  ;;  %s879_s0 = inlined_call_operand.hbm [shape: f32[4,512], index: 0, kind: input, shape index: {}, may-alias: {0,3}]   ;;  %s880_s1 = inlined_call_operand.hbm [shape: f32[4,4,512], index: 1, kind: input, shape index: {}]   ;;  %s881_s2 = inlined_call_operand.hbm [shape: f32[4,4,512], index: 2, kind: output, shape index: {0}]   ;;  %s882_s3 = inlined_call_operand.hbm [shape: f32[4,512], index: 3, kind: output, shape index: {1}, may-alias: {0,3}]  }
   0x1   :  { %10 = vsyncpa [#allocation6], 0 }
   0x2   :  { %12 = vsyncpa [#allocation6 + $0x1], 0 }
   0x3   :  { %13 = vsyncpa [#allocation4], 0 }
   0x4   :  { %15 = vsyncpa [#allocation4 + $0x1], 0 }
   0x5   :  { %16 = vsyncpa [#allocation9], 0  ;;  %s714_s12 = smov 0   ;;  %s716_s13 = smov 0  }
   0x6   :  { %s718_s14 = smov 0   ;;  %s720_s15 = smov 0  }
   0x7   :  { %s722_s16 = smov 0   ;;  %s724_s17 = smov 0  }
   0x8 LB: > { %s408_s18 = sadd.s32 4294967295, %s689_s17   ;;  %s409_s19 = sadd.s32 4294967294, %s689_s17   ;;  %s689_s17 = sphi %s724_s17, %s22_s17   ;;  %s685_s16 = sphi %s722_s16, %s894_s16   ;;  %s681_s15 = sphi %s720_s15, %s893_s15   ;;  %s677_s14 = sphi %s718_s14, %s892_s14   ;;  %s673_s13 = sphi %s716_s13, %s891_s13   ;;  %s669_s12 = sphi %s714_s12, %s890_s12  }
   0x9   : > { %p82_p0 = scmp.ne.s32.totalorder %s673_s13, %s669_s12  ;;  %p748_p1 = scmp.eq.s32.totalorder %s408_s18, 0 }
   0xa   : > { %p752_p2 = scmp.eq.s32.totalorder %s408_s18, 3  ;;  %p114_p3 = scmp.eq.s32.totalorder %s409_s19, 3 }
   0xb   : > { %p758_p4 = por %p748_p1, %p82_p0  ;;  %p410_p5 = scmp.ge.s32.totalorder %s689_s17, 1 }
   0xc   : > { %p763_p6 = por %p114_p3, %p82_p0  ;;  %p147_p7 = scmp.lt.s32.totalorder %s689_s17, 5 }
   0xd   : > { %s162_s26 = sshll.u32 %s879_s0, 4  ;;  %s691_s28 = smov [#allocation2]   ;;  %s163_s26 = int_to_ptr.hbm [resolvable:$true] %s162_s26 }
   0xe   : > { %p771_p8 = pnand %p410_p5, %p147_p7  ;;  %s164_s29 = sshll.u32 %s691_s28, 4  ;;  %s165_s29 = int_to_ptr.vmem [resolvable:$true] %s164_s29 }
   0xf   : > { %s31_s30 = sadd.s32 1, %s685_s16  ;;  %s69_s4 = sadd.s32 1, %s677_s14 }
  0x10   : > { %p442_p9 = pneg %p771_p8  ;;  %p32_p11 = scmp.ge.s32.totalorder %s31_s30, 4 }
  0x11   : > { %p76_p12 = scmp.ne.s32.totalorder %s677_s14, %s673_s13  ;;  %p77_p13 = scmp.eq.s32.totalorder %s689_s17, 0 }
  0x12   : > { %p443_p10 = pnand %p442_p9, %p748_p1  ;;  %s896_s30 = smov (%p32_p11, %s31_s30), 0 }
  0x13   : > { %p786_p0 = por %p77_p13, %p76_p12  ;;  %p792_p3 = por %p752_p2, %p76_p12 }
  0x14   : > { %445 = dma.hbm_to_vmem [thread:$0]  (!%p443_p10), %s163_s26, 256, %s165_s29, [#allocation3]  }
  0x15   : > { %s64_s7 = ssub.s32 %s685_s16, %s896_s30  ;;  %p455_p5 = scmp.lt.s32.totalorder %s689_s17, 4 }
  0x16   : > { %p67_p7 = scmp.eq.s32.totalorder %s64_s7, 0  ;;  %s175_s8 = sand.u32 1, %s677_s14  }
  0x17   : > { %s413_s9 = sshll.u32 %s175_s8, 4  ;;  %s428_s11 = sshll.u32 %s685_s16, 4 }
  0x18   : > { %s801_s10 = scalar_select %p67_p7, %s677_s14, %s69_s4  }
  0x19   : > { %s186_s24 = scalar_lea.hbm %s880_s1, %s428_s11  ;;  %s179_s25 = scalar_lea.vmem [#allocation5], %s413_s9 }
  0x1a   : > { %s190_s26 = sshll.u32 %s179_s25, 4  ;;  %s188_s28 = sshll.u32 %s186_s24, 4  ;;  %s191_s26 = int_to_ptr.vmem [resolvable:$true] %s190_s26  ;;  %s189_s28 = int_to_ptr.hbm [resolvable:$true] %s188_s28 }
  0x1b   : > { %p447_p9 = pnand %p455_p5, %p786_p0  ;;  %s176_s29 = scalar_lea.sflag [#allocation6], %s175_s8 }
  0x1c   : > { %199 = sbr.rel (%p771_p8) target bundleno = 70 (0x46), region = 28 }
  0x1d   : > { %449 = dma.hbm_to_vmem [thread:$0]  (!%p447_p9), %s189_s28, 256, %s191_s26, %s176_s29  }
  0x21   : > { %652 = dma.done.wait (%p748_p1), [#allocation3], 256  }
  0x22   : > { %654 = vsyncadd (%p748_p1), [#allocation3], 4294967040  ;;  %s816_s4 = sand.u32 1, %s673_s13  }
  0x23   : > { %s418_s7 = sshll.u32 %s816_s4, 4  ;;  %s207_s5 = scalar_lea.sflag [#allocation6], %s816_s4 }
  0x24   : > { %s210_s9 = scalar_lea.vmem [#allocation5], %s418_s7 }
  0x25   : > { %656 = dma.done.wait (%p758_p4), %s207_s5, 256  }
  0x26   : > { %658 = vsyncadd (%p758_p4), %s207_s5, 4294967040  ;;  %s824_s27 = scalar_lea.vmem [#allocation7], %s418_s7  ;;  %p420_p8 = scmp.ne.s32.totalorder %s681_s15, 0 }
  0x28   : > { %237 = sbr.rel (%p420_p8) target bundleno = 48 (0x30), region = 40 }
  0x2d   : > { %v238_v0 = vld [vmem:[#allocation2] sm:$0xff]  ;;  %v239_v1 = vld [vmem:[#allocation2 + $0x8] sm:$0xff] }
  0x2e   : > { %240 = vst [vmem:[#allocation8] sm:$0xff] %v238_v0 }
  0x2f   : > { %241 = vst [vmem:[#allocation8 + $0x8] sm:$0xff] %v239_v1 }
  0x30 PF: > { %v244_v3 = vld [vmem:[%s210_s9] sm:$0xff]  ;;  %s429_s20 = sshll.u32 %s681_s15, 4  ;;  %v245_v6 = vld [vmem:[%s210_s9 + $0x8] sm:$0xff]  ;;  %s278_s18 = sshll.u32 %s824_s27, 4  ;;  %v693_v12 = vmov 0.0   ;;  %s279_s18 = int_to_ptr.vmem [resolvable:$true] %s278_s18 }
  0x31   : > { %s276_s11 = scalar_lea.hbm %s881_s2, %s429_s20  ;;  %s692_s24 = smov [#allocation8]  }
  0x32   : > { %s280_s19 = sshll.u32 %s276_s11, 4  ;;  %s832_s25 = sshll.u32 %s692_s24, 4  ;;  %s281_s19 = int_to_ptr.hbm [resolvable:$true] %s280_s19  ;;  %s294_s25 = int_to_ptr.vmem [resolvable:$true] %s832_s25 }
  0x33   : > { %s295_s28 = sshll.u32 %s882_s3, 4  ;;  %s263_s29 = scalar_lea.sflag [#allocation4], %s816_s4  ;;  %s296_s28 = int_to_ptr.hbm [resolvable:$true] %s295_s28 }
  0x34   : > { %s585_s7 = sshra.s32 %s281_s19, 4  ;;  %s591_s22 = scalar_lea.hbm %s881_s2, 64  ;;  %s586_s7 = int_to_ptr.hbm [resolvable:$true] %s585_s7 }
  0x35   : > { %v242_v2 = vld [vmem:[#allocation8] sm:$0xff]  ;;  %s587_s5 = scalar_lea.hbm %s586_s7, 16  ;;  %p592_p11 = scmp.lt.s32.totalorder %s586_s7, %s881_s2 }
  0x36   : > { %v243_v4 = vld [vmem:[#allocation8 + $0x8] sm:$0xff]  ;;  %v246_v5 = vsub.f32 %v244_v3, %v242_v2  ;;  %p588_p1 = scmp.ne.s32.totalorder %s586_s7, %s587_s5  ;;  %p593_p12 = scmp.lt.s32.totalorder %s591_s22, %s587_s5 }
  0x37   : > { %v247_v7 = vsub.f32 %v245_v6, %v243_v4 }
  0x38   : > { %v248_v8 = vmul.f32 0.5, %v246_v5  ;;  %p589_p4 = pnand %p588_p1, %p792_p3  ;;  %p594_p13 = por %p593_p12, %p592_p11 }
  0x39   : > { %v249_v9 = vmul.f32 0.5, %v247_v7 }
  0x3a   : > { %v250_v10 = vadd.f32 %v248_v8, %v242_v2  ;;  %p590_p10 = pneg %p589_p4 }
  0x3b   : > { %v251_v11 = vadd.f32 %v249_v9, %v243_v4 }
  0x3c   : > { %vm252_vm0 = vcmp.ge.f32.partialorder %v250_v10, 1.0  ;;  %p595_p0 = pnand %p594_p13, %p590_p10 }
  0x3d   : > { %v254_v13 = vsel %vm252_vm0, 1.0, %v693_v12  ;;  %vm253_vm1 = vcmp.ge.f32.partialorder %v251_v11, 1.0  ;;  %v258_v14 = vsel %vm252_vm0, 0.0, %v250_v10 }
  0x3e   : > { %256 = vst [vmem:[%s824_s27] sm:$0xff] %v254_v13  ;;  %v255_v15 = vsel %vm253_vm1, 1.0, %v693_v12  ;;  %v259_v16 = vsel %vm253_vm1, 0.0, %v251_v11 }
  0x3f   : > { %257 = vst [vmem:[%s824_s27 + $0x8] sm:$0xff] %v255_v15 }
  0x40   : > { %260 = vst [vmem:[#allocation8] sm:$0xff] %v258_v14 }
  0x41   : > { %598 = shalt.err (!%p595_p0)
}
  0x42   : > { %436 = dma.vmem_to_hbm [thread:$0]  (%p792_p3), %s279_s18, 256, %s281_s19, %s263_s29   ;;  %261 = vst [vmem:[#allocation8 + $0x8] sm:$0xff] %v259_v16 }
  0x43   : > { %438 = dma.vmem_to_hbm [thread:$0]  (%p752_p2), %s294_s25, 256, %s296_s28, [#allocation9]  }
  0x44   : > { %660 = dma.done.wait (%p752_p2), [#allocation9], 256  }
  0x45   : > { %662 = vsyncadd (%p752_p2), [#allocation9], 4294967040 }
  0x46 PF: > { %p459_p5 = scmp.ge.s32.totalorder %s689_s17, 2  ;;  %s312_s4 = sand.u32 1, %s669_s12  }
  0x47   : > { %s313_s6 = scalar_lea.sflag [#allocation4], %s312_s4 }
  0x48   : > { %p451_p7 = pnand %p459_p5, %p763_p6 }
  0x4a   : > { %p452_p9 = pneg %p451_p7 }
  0x4c   : > { %664 = dma.done.wait (%p452_p9), %s313_s6, 256  }
  0x4d   : > { %666 = vsyncadd (%p452_p9), %s313_s6, 4294967040  ;;  %s22_s17 = sadd.s32 1, %s689_s17   ;;  %s890_s12 = smov %s673_s13 }
  0x4e   : > { %p19_p3 = scmp.ge.s32.totalorder %s22_s17, 6   ;;  %s891_s13 = smov %s677_s14 }
  0x4f   : > { %s892_s14 = smov %s801_s10  ;;  %s893_s15 = smov %s685_s16 }
  0x50   : > { %s894_s16 = smov %s896_s30  ;;  %21 = sbr.rel (!%p19_p3) target bundleno = 8 (0x8), region = 92 }
  0x55   :  { %319 = vsyncpa [#allocation3], 1 }
  0x56   :  { %321 = vsyncpa [#allocation3 + $0x1], 1 }
  0x57   :  { %322 = vsyncpa [#allocation6], 1 }
  0x58   :  { %324 = vsyncpa [#allocation6 + $0x1], 1 }
  0x59   :  { %325 = vsyncpa [#allocation4], 1 }
  0x5a   :  { %327 = vsyncpa [#allocation4 + $0x1], 1 }
  0x5b   :  { %328 = vsyncpa [#allocation9], 1 }

</bundles_post_ra>
